<compile_context>
chip_gen: v6e
topology: v6e:2x2x1
jax: 0.10.0
libtpu: 0.0.40
codegen_flags: <defaults>
</compile_context>

<pallas_src>
import functools
import math

import jax
import jax.numpy as jnp
import numpy as np
from jax import lax
from jax.experimental import pallas as pl
from jax.experimental.pallas import tpu as pltpu


# ---------------------------------------------------------------------------
# Padding sizes exactly as the PyTorch module computes them.
# ---------------------------------------------------------------------------
def _compute_pads(kernel, dilation=1):
    if kernel % 2 == 0:
        pad_l = dilation * (kernel - 2) // 2 + 1
        pad_r = dilation * kernel // 2 + 1
    else:
        pad_l = dilation * (kernel - 1) // 2 + 1
        pad_r = dilation * (kernel - 1) // 2 + 1
    return pad_l, pad_r


def _round_up(n, m):
    return ((n + m - 1) // m) * m


# ---------------------------------------------------------------------------
# Fused kernel.  One grid step = `tb` batch elements.
# x arrives channel-last with even/odd interleaved on lanes:
#   x_ref[:, t, 0:C] = x_even[:, t, :],   x_ref[:, t, C:2C] = x_odd[:, t, :]
# phi and psi are fused via block-structured weights so a single pair of
# im2col matmuls produces [y_phi | y_psi]; the residual base is x_ref itself.
# ---------------------------------------------------------------------------
def _interactor_level_kernel(x_ref, w1_ref, b1_ref, w2_ref, b2_ref, out_ref,
                             *, pad_l, K1, K2, L1p, Thp, mxu_dtype):
    tb, Th, C2 = x_ref.shape
    H2 = w1_ref.shape[1]

    xf = x_ref[...].astype(jnp.float32)                        # (tb, Th, 2C)

    # Replication pad along time (edge-row broadcasts + one sublane concat).
    # Right pad is extended so every im2col tap of sublane-aligned length L1p
    # stays in range; the extra rows only feed output rows that are discarded.
    Lp_pad = L1p + K1 - 1
    n_left = pad_l
    n_right = Lp_pad - Th - pad_l
    parts = []
    if n_left > 0:
        parts.append(jnp.broadcast_to(xf[:, :1, :], (tb, n_left, C2)))
    parts.append(xf)
    if n_right > 0:
        parts.append(jnp.broadcast_to(xf[:, Th - 1:Th, :], (tb, n_right, C2)))
    xp = jnp.concatenate(parts, axis=1) if len(parts) > 1 else xf

    # conv1 (kernel K1) for BOTH branches: im2col + one MXU matmul.
    cols1 = jnp.concatenate([xp[:, k:k + L1p, :] for k in range(K1)], axis=-1)
    h = jnp.dot(cols1.reshape(tb * L1p, K1 * C2).astype(mxu_dtype), w1_ref[...],
                preferred_element_type=jnp.float32)            # (tb*L1p, 2H)
    h = h + b1_ref[...]                                        # f32 bias add
    h = jnp.where(h > 0, h, 0.01 * h)                          # LeakyReLU(0.01), f32
    # TODO(synk): Dropout(p) is identity here (eval-mode forward, no RNG path).
    h = h.reshape(tb, L1p, H2)

    # conv2 (kernel K2, valid) for BOTH branches: im2col + one MXU matmul.
    cols2 = jnp.concatenate([h[:, k:k + Thp, :] for k in range(K2)], axis=-1)
    y = jnp.dot(cols2.reshape(tb * Thp, K2 * H2).astype(mxu_dtype), w2_ref[...],
                preferred_element_type=jnp.float32)            # (tb*Thp, 2C)
    y = jnp.tanh(y + b2_ref[...]).reshape(tb, Thp, C2)

    # Residual: [x_even | x_odd] + [tanh(y_phi) | tanh(y_psi)]  (lane-merged).
    out_ref[...] = (xf + y[:, :Th, :]).astype(out_ref.dtype)


# ---------------------------------------------------------------------------
# Host-side fused weight packing (block-structured so no in-kernel lane swap).
#   cols1 tap layout per 2C block: [even | odd]  ->  h columns: [h_phi | h_psi]
#   cols2 tap layout per 2H block: [h_phi|h_psi] ->  y columns: [y_phi | y_psi]
# ---------------------------------------------------------------------------
def _pack_fused_params(phi_p, psi_p, mxu_dtype):
    K1, C, H = phi_p["w1"].shape
    K2 = phi_p["w2"].shape[0]
    zCH = jnp.zeros((C, H), jnp.float32)
    zHC = jnp.zeros((H, C), jnp.float32)

    w1_blocks = []
    for k in range(K1):
        even_rows = jnp.concatenate([zCH, psi_p["w1"][k]], axis=1)  # x_even -> psi
        odd_rows = jnp.concatenate([phi_p["w1"][k], zCH], axis=1)   # x_odd  -> phi
        w1_blocks.append(jnp.concatenate([even_rows, odd_rows], axis=0))
    W1 = jnp.concatenate(w1_blocks, axis=0)                         # (K1*2C, 2H)

    w2_blocks = []
    for k in range(K2):
        phi_rows = jnp.concatenate([phi_p["w2"][k], zHC], axis=1)   # h_phi -> y_phi
        psi_rows = jnp.concatenate([zHC, psi_p["w2"][k]], axis=1)   # h_psi -> y_psi
        w2_blocks.append(jnp.concatenate([phi_rows, psi_rows], axis=0))
    W2 = jnp.concatenate(w2_blocks, axis=0)                         # (K2*2H, 2C)

    b1 = jnp.concatenate([phi_p["b1"], psi_p["b1"]]).reshape(1, 2 * H).astype(jnp.float32)
    b2 = jnp.concatenate([phi_p["b2"], psi_p["b2"]]).reshape(1, 2 * C).astype(jnp.float32)
    return W1.astype(mxu_dtype), b1, W2.astype(mxu_dtype), b2


# ---------------------------------------------------------------------------
# Generation-aware tiling helpers.
# ---------------------------------------------------------------------------
def _device_kind():
    try:
        return jax.devices()[0].device_kind.lower()
    except Exception:
        return ""


def _num_tensorcores(kind=None):
    kind = _device_kind() if kind is None else kind
    # v7x (and v4 megacore) expose 2 TensorCores that shard "parallel" grid
    # axes; v5e/v6e have a single TensorCore, so no 2-step grid floor there.
    return 2 if ("v7" in kind or "v4" in kind) else 1


def _vmem_capacity_bytes():
    try:
        return int(pltpu.get_tpu_info().vmem_capacity_bytes)
    except Exception:
        return 64 << 20   # conservative fallback (v7x per-TensorCore VMEM)


def _pick_batch_tile(B, rows_per_batch, bytes_per_batch, *, target_rows,
                     vmem_budget, num_cores):
    cap_rows = max(1, target_rows // max(rows_per_batch, 1))
    cap_vmem = max(1, int(vmem_budget // max(bytes_per_batch, 1)))
    cap = max(1, min(B, cap_rows, cap_vmem))
    if num_cores >= 2 and B >= num_cores:
        # Keep >= num_cores grid steps so the "parallel" axis can be core-sharded.
        cap = min(cap, max(1, B // num_cores))
    tb = 1
    for d in range(1, int(cap) + 1):
        if B % d == 0:
            tb = d
    return tb


# ---------------------------------------------------------------------------
# Wrapper.
# ---------------------------------------------------------------------------
def interactor_level_forward(x, phi_p, psi_p, kernel, *, mxu_dtype=jnp.float32):
    """x: (B, T, C). Returns (x_even_update, x_odd_update), each (B, C, T//2),
    matching the PyTorch module's output layout."""
    B, T, C = x.shape
    assert T % 2 == 0, "sequence length must be even"
    Th = T // 2
    pad_l, pad_r = _compute_pads(kernel)

    K1, Cw, H = phi_p["w1"].shape
    K2 = phi_p["w2"].shape[0]
    assert Cw == C and K1 == kernel
    assert Th + pad_l + pad_r - K1 - K2 + 2 == Th, "module padding keeps length T//2"

    C2, H2 = 2 * C, 2 * H
    L1 = Th + pad_l + pad_r - K1 + 1          # rows after conv1
    Thp = _round_up(Th, 8)                    # sublane-aligned conv2 output rows
    L1p = _round_up(max(L1, Thp + K2 - 1), 8)  # sublane-aligned conv1 output rows

    # Even/odd split as a free contiguous reshape: lanes [0:C]=even, [C:2C]=odd.
    x_merged = x.reshape(B, Th, C2)

    W1, b1, W2, b2 = _pack_fused_params(phi_p, psi_p, mxu_dtype)

    # ---- VMEM budgeting (per batch element, per grid step) ----
    mxu_sz = np.dtype(mxu_dtype).itemsize
    xin_sz = x.dtype.itemsize
    per_batch = (
        Th * C2 * xin_sz * 2                  # input block (double buffered)
        + Th * C2 * xin_sz * 2                # output block (double buffered)
        + (L1p + K1 - 1) * C2 * 4             # padded x (f32)
        + L1p * K1 * C2 * (4 + mxu_sz)        # cols1 (f32 + MXU-dtype copy)
        + L1p * H2 * 4                        # h
        + Thp * K2 * H2 * (4 + mxu_sz)        # cols2
        + Thp * C2 * 4)                       # y
    weight_bytes = (W1.size + W2.size) * mxu_sz + (b1.size + b2.size) * 4
    capacity = _vmem_capacity_bytes()
    budget = max(1 << 20, capacity // 2 - 2 * weight_bytes)
    num_cores = _num_tensorcores()

    tb = _pick_batch_tile(B, L1p, per_batch, target_rows=768,
                          vmem_budget=budget, num_cores=num_cores)
    assert B % tb == 0, "batch tile must divide B"
    grid = (B // tb,)

    cp_kwargs = dict(dimension_semantics=("parallel",))
    needed = int(tb * per_batch + 2 * weight_bytes) + (1 << 20)
    if needed > (30 << 20):   # only raise above the default scoped-VMEM limit
        cp_kwargs["vmem_limit_bytes"] = int(min(needed * 5 // 4, capacity * 9 // 10))

    kernel_fn = functools.partial(
        _interactor_level_kernel, pad_l=pad_l, K1=K1, K2=K2,
        L1p=L1p, Thp=Thp, mxu_dtype=mxu_dtype)

    def invariant(a):
        return pl.BlockSpec(a.shape, lambda b: (0,) * a.ndim)

    out = pl.pallas_call(
        kernel_fn,
        out_shape=jax.ShapeDtypeStruct((B, Th, C2), x.dtype),
        grid_spec=pltpu.PrefetchScalarGridSpec(
            num_scalar_prefetch=0,
            grid=grid,
            in_specs=[
                pl.BlockSpec((tb, Th, C2), lambda b: (b, 0, 0)),
                invariant(W1), invariant(b1), invariant(W2), invariant(b2),
            ],
            out_specs=pl.BlockSpec((tb, Th, C2), lambda b: (b, 0, 0)),
        ),
        compiler_params=pltpu.CompilerParams(**cp_kwargs),
    )(x_merged, W1, b1, W2, b2)

    # Split the lane-merged output and match PyTorch's (B, C, T//2) layout once.
    even_upd = jnp.transpose(out[..., :C], (0, 2, 1))
    odd_upd = jnp.transpose(out[..., C:], (0, 2, 1))
    return even_upd, odd_upd


# ---------------------------------------------------------------------------
# Parameter init (deterministic, PyTorch Conv1d-default-like uniform bounds).
#   w1: (K1, C, H)  == torch weight (H, C, K1) with axes (k, ci, co)
#   w2: (K2, H, C)
# ---------------------------------------------------------------------------
def init_branch_params(key, in_planes, hidden_mult, kernel):
    C = in_planes
    H = int(in_planes * hidden_mult)
    k1, k2, k3, k4 = jax.random.split(key, 4)
    bd1 = 1.0 / math.sqrt(C * kernel)
    bd2 = 1.0 / math.sqrt(H * 3)
    w1 = jax.random.uniform(k1, (kernel, C, H), jnp.float32, -bd1, bd1)
    b1 = jax.random.uniform(k2, (H,), jnp.float32, -bd1, bd1)
    w2 = jax.random.uniform(k3, (3, H, C), jnp.float32, -bd2, bd2)
    b2 = jax.random.uniform(k4, (C,), jnp.float32, -bd2, bd2)
    return dict(w1=w1, b1=b1, w2=w2, b2=b2)


# ---------------------------------------------------------------------------
# Pure-JAX reference (independent lax.conv path) for correctness checking.
# ---------------------------------------------------------------------------
def _ref_branch(x_src, base, p, pad_l, pad_r):
    xpad = jnp.concatenate(
        [jnp.repeat(x_src[:, :1, :], pad_l, axis=1),
         x_src,
         jnp.repeat(x_src[:, -1:, :], pad_r, axis=1)], axis=1)
    dn = ("NWC", "WIO", "NWC")
    h = lax.conv_general_dilated(xpad, p["w1"], (1,), "VALID",
                                 dimension_numbers=dn) + p["b1"]
    h = jnp.where(h > 0, h, 0.01 * h)
    y = lax.conv_general_dilated(h, p["w2"], (1,), "VALID",
                                 dimension_numbers=dn) + p["b2"]
    return base + jnp.tanh(y)


def _ref_forward(x, phi_p, psi_p, kernel):
    pad_l, pad_r = _compute_pads(kernel)
    x_even, x_odd = x[:, ::2, :], x[:, 1::2, :]
    e = _ref_branch(x_odd, x_even, phi_p, pad_l, pad_r)
    o = _ref_branch(x_even, x_odd, psi_p, pad_l, pad_r)
    return jnp.transpose(e, (0, 2, 1)), jnp.transpose(o, (0, 2, 1))


if __name__ == "__main__":
    # Small shapes consistent with the module: in_planes=4, seq T=16, batch=2,
    # hidden_size=2 (hidden conv channels = 8), kernel=5.
    B, T, C = 2, 16, 4
    KERNEL = 5
    HIDDEN_MULT = 2

    key = jax.random.PRNGKey(0)
    kx, kphi, kpsi = jax.random.split(key, 3)
    x = jax.random.normal(kx, (B, T, C), jnp.float32)

    phi_p = init_branch_params(kphi, C, HIDDEN_MULT, KERNEL)
    psi_p = init_branch_params(kpsi, C, HIDDEN_MULT, KERNEL)

    # bf16 MXU inputs on v6e/v7x (f32 accumulation, f32 elementwise everywhere);
    # keep pure f32 on v5e / unknown chips.
    kind = _device_kind()
    use_bf16 = ("v6" in kind) or ("v7" in kind)
    mxu_dtype = jnp.bfloat16 if use_bf16 else jnp.float32

    fwd = jax.jit(functools.partial(interactor_level_forward,
                                    kernel=KERNEL, mxu_dtype=mxu_dtype))
    even_upd, odd_upd = fwd(x, phi_p, psi_p)
    jax.block_until_ready((even_upd, odd_upd))

    # Sanity check against an independent lax.conv reference.
    ref_e, ref_o = _ref_forward(x, phi_p, psi_p, KERNEL)
    tol = 5e-2 if use_bf16 else 1e-5
    np.testing.assert_allclose(np.asarray(even_upd), np.asarray(ref_e),
                               rtol=tol, atol=tol)
    np.testing.assert_allclose(np.asarray(odd_upd), np.asarray(ref_o),
                               rtol=tol, atol=tol)
    assert even_upd.shape == (B, C, T // 2) and odd_upd.shape == (B, C, T // 2)

    print("KERNEL_OK")
</pallas_src>

<mosaic_0001>
module attributes {stable_mosaic.version = 11 : i64} {
  func.func @_interactor_level_kernel(%arg0: i32, %arg1: memref<2x8x8xf32, #tpu.memory_space<vmem>>, %arg2: memref<40x16xf32, #tpu.memory_space<vmem>>, %arg3: memref<1x16xf32, #tpu.memory_space<vmem>>, %arg4: memref<48x8xf32, #tpu.memory_space<vmem>>, %arg5: memref<1x8xf32, #tpu.memory_space<vmem>>, %arg6: memref<2x8x8xf32, #tpu.memory_space<vmem>>) attributes {dimension_semantics = [#tpu.dimension_semantics<parallel>], iteration_bounds = array<i64: 1>, scalar_prefetch = 0 : i64, scratch_operands = 0 : i64, tpu.core_type = #tpu.core_type<tc>, window_params = [{transform_indices = @transform_0, window_bounds = array<i64: 2, 8, 8>}, {pipeline_mode = #tpu.pipeline_mode<synchronous>, transform_indices = @transform_1, window_bounds = array<i64: 40, 16>}, {pipeline_mode = #tpu.pipeline_mode<synchronous>, transform_indices = @transform_2, window_bounds = array<i64: 1, 16>}, {pipeline_mode = #tpu.pipeline_mode<synchronous>, transform_indices = @transform_3, window_bounds = array<i64: 48, 8>}, {pipeline_mode = #tpu.pipeline_mode<synchronous>, transform_indices = @transform_4, window_bounds = array<i64: 1, 8>}, {transform_indices = @transform_5, window_bounds = array<i64: 2, 8, 8>}]} {
    %c0 = arith.constant 0 : index
    %c0_0 = arith.constant 0 : index
    %c0_1 = arith.constant 0 : index
    %0 = vector.load %arg1[%c0, %c0_0, %c0_1] : memref<2x8x8xf32, #tpu.memory_space<vmem>>, vector<2x8x8xf32>
    %1 = vector.extract_strided_slice %0 {offsets = [0, 0, 0], sizes = [2, 1, 8], strides = [1, 1, 1]} : vector<2x8x8xf32> to vector<2x1x8xf32>
    %2 = vector.shape_cast %1 : vector<2x1x8xf32> to vector<2x1x8xf32>
    %3 = vector.broadcast %2 : vector<2x1x8xf32> to vector<2x3x8xf32>
    %4 = vector.extract_strided_slice %0 {offsets = [0, 7, 0], sizes = [2, 1, 8], strides = [1, 1, 1]} : vector<2x8x8xf32> to vector<2x1x8xf32>
    %5 = vector.shape_cast %4 : vector<2x1x8xf32> to vector<2x1x8xf32>
    %6 = vector.broadcast %5 : vector<2x1x8xf32> to vector<2x9x8xf32>
    %7 = tpu.concatenate %3, %0, %6 in 1 : vector<2x3x8xf32>, vector<2x8x8xf32>, vector<2x9x8xf32> -> vector<2x20x8xf32>
    %8 = vector.extract_strided_slice %7 {offsets = [0, 0, 0], sizes = [2, 16, 8], strides = [1, 1, 1]} : vector<2x20x8xf32> to vector<2x16x8xf32>
    %9 = vector.extract_strided_slice %7 {offsets = [0, 1, 0], sizes = [2, 16, 8], strides = [1, 1, 1]} : vector<2x20x8xf32> to vector<2x16x8xf32>
    %10 = vector.extract_strided_slice %7 {offsets = [0, 2, 0], sizes = [2, 16, 8], strides = [1, 1, 1]} : vector<2x20x8xf32> to vector<2x16x8xf32>
    %11 = vector.extract_strided_slice %7 {offsets = [0, 3, 0], sizes = [2, 16, 8], strides = [1, 1, 1]} : vector<2x20x8xf32> to vector<2x16x8xf32>
    %12 = vector.extract_strided_slice %7 {offsets = [0, 4, 0], sizes = [2, 16, 8], strides = [1, 1, 1]} : vector<2x20x8xf32> to vector<2x16x8xf32>
    %13 = tpu.concatenate %8, %9, %10, %11, %12 in 2 : vector<2x16x8xf32>, vector<2x16x8xf32>, vector<2x16x8xf32>, vector<2x16x8xf32>, vector<2x16x8xf32> -> vector<2x16x40xf32>
    %14 = vector.shape_cast %13 : vector<2x16x40xf32> to vector<32x40xf32>
    %c0_2 = arith.constant 0 : index
    %c0_3 = arith.constant 0 : index
    %15 = vector.load %arg2[%c0_2, %c0_3] : memref<40x16xf32, #tpu.memory_space<vmem>>, vector<40x16xf32>
    %cst = arith.constant dense<0.000000e+00> : vector<32x16xf32>
    %16 = tpu.matmul %14, %15, %cst {dimension_numbers = #tpu.dot_dimension_numbers<[1], [0], [0], [1], [0, 0, 1, 1], [], []>} : vector<32x40xf32>, vector<40x16xf32>, vector<32x16xf32> -> vector<32x16xf32>
    %c0_4 = arith.constant 0 : index
    %c0_5 = arith.constant 0 : index
    %17 = vector.load %arg3[%c0_4, %c0_5] : memref<1x16xf32, #tpu.memory_space<vmem>>, vector<1x16xf32>
    %18 = vector.broadcast %17 : vector<1x16xf32> to vector<32x16xf32>
    %19 = arith.addf %16, %18 : vector<32x16xf32>
    %cst_6 = arith.constant 0.000000e+00 : f32
    %20 = vector.broadcast %cst_6 : f32 to vector<32x16xf32>
    %21 = arith.cmpf ogt, %19, %20 : vector<32x16xf32>
    %cst_7 = arith.constant 0.00999999977 : f32
    %22 = vector.broadcast %cst_7 : f32 to vector<32x16xf32>
    %23 = arith.mulf %22, %19 : vector<32x16xf32>
    %24 = arith.select %21, %19, %23 : vector<32x16xi1>, vector<32x16xf32>
    %25 = vector.shape_cast %24 : vector<32x16xf32> to vector<2x16x16xf32>
    %26 = vector.extract_strided_slice %25 {offsets = [0, 0, 0], sizes = [2, 8, 16], strides = [1, 1, 1]} : vector<2x16x16xf32> to vector<2x8x16xf32>
    %27 = vector.extract_strided_slice %25 {offsets = [0, 1, 0], sizes = [2, 8, 16], strides = [1, 1, 1]} : vector<2x16x16xf32> to vector<2x8x16xf32>
    %28 = vector.extract_strided_slice %25 {offsets = [0, 2, 0], sizes = [2, 8, 16], strides = [1, 1, 1]} : vector<2x16x16xf32> to vector<2x8x16xf32>
    %29 = tpu.concatenate %26, %27, %28 in 2 : vector<2x8x16xf32>, vector<2x8x16xf32>, vector<2x8x16xf32> -> vector<2x8x48xf32>
    %30 = vector.shape_cast %29 : vector<2x8x48xf32> to vector<16x48xf32>
    %c0_8 = arith.constant 0 : index
    %c0_9 = arith.constant 0 : index
    %31 = vector.load %arg4[%c0_8, %c0_9] : memref<48x8xf32, #tpu.memory_space<vmem>>, vector<48x8xf32>
    %cst_10 = arith.constant dense<0.000000e+00> : vector<16x8xf32>
    %32 = tpu.matmul %30, %31, %cst_10 {dimension_numbers = #tpu.dot_dimension_numbers<[1], [0], [0], [1], [0, 0, 1, 1], [], []>} : vector<16x48xf32>, vector<48x8xf32>, vector<16x8xf32> -> vector<16x8xf32>
    %c0_11 = arith.constant 0 : index
    %c0_12 = arith.constant 0 : index
    %33 = vector.load %arg5[%c0_11, %c0_12] : memref<1x8xf32, #tpu.memory_space<vmem>>, vector<1x8xf32>
    %34 = vector.broadcast %33 : vector<1x8xf32> to vector<16x8xf32>
    %35 = arith.addf %32, %34 : vector<16x8xf32>
    %36 = math.tanh %35 : vector<16x8xf32>
    %37 = vector.shape_cast %36 : vector<16x8xf32> to vector<2x8x8xf32>
    %38 = arith.addf %0, %37 : vector<2x8x8xf32>
    %c0_13 = arith.constant 0 : index
    %c0_14 = arith.constant 0 : index
    %c0_15 = arith.constant 0 : index
    %39 = vector.load %arg6[%c0_13, %c0_14, %c0_15] : memref<2x8x8xf32, #tpu.memory_space<vmem>>, vector<2x8x8xf32>
    tpu.vector_store %arg6[%c0_13, %c0_14, %c0_15], %38 {strides = array<i32>} : memref<2x8x8xf32, #tpu.memory_space<vmem>>, vector<2x8x8xf32>,
    return
  }
  func.func @transform_0(%arg0: i32) -> (i32, i32, i32) {
    %c0_i32 = arith.constant 0 : i32
    %c0_i32_0 = arith.constant 0 : i32
    %c0_i32_1 = arith.constant 0 : i32
    return %arg0, %c0_i32, %c0_i32_0 : i32, i32, i32
  }
  func.func @transform_1(%arg0: i32) -> (i32, i32) {
    %c0_i32 = arith.constant 0 : i32
    %c0_i32_0 = arith.constant 0 : i32
    %c0_i32_1 = arith.constant 0 : i32
    return %c0_i32, %c0_i32_0 : i32, i32
  }
  func.func @transform_2(%arg0: i32) -> (i32, i32) {
    %c0_i32 = arith.constant 0 : i32
    %c0_i32_0 = arith.constant 0 : i32
    %c0_i32_1 = arith.constant 0 : i32
    return %c0_i32, %c0_i32_0 : i32, i32
  }
  func.func @transform_3(%arg0: i32) -> (i32, i32) {
    %c0_i32 = arith.constant 0 : i32
    %c0_i32_0 = arith.constant 0 : i32
    %c0_i32_1 = arith.constant 0 : i32
    return %c0_i32, %c0_i32_0 : i32, i32
  }
  func.func @transform_4(%arg0: i32) -> (i32, i32) {
    %c0_i32 = arith.constant 0 : i32
    %c0_i32_0 = arith.constant 0 : i32
    %c0_i32_1 = arith.constant 0 : i32
    return %c0_i32, %c0_i32_0 : i32, i32
  }
  func.func @transform_5(%arg0: i32) -> (i32, i32, i32) {
    %c0_i32 = arith.constant 0 : i32
    %c0_i32_0 = arith.constant 0 : i32
    %c0_i32_1 = arith.constant 0 : i32
    return %arg0, %c0_i32, %c0_i32_0 : i32, i32, i32
  }
}

</mosaic_0001>

<bundles_post_ra>
// kernel: interactor_level_forward.1
= control target key start
LH: loop header
LB: loop body
LE: loop exit
PB: predicated region body
PF: predicated region fallthrough
CT: control target
= control target key end

     0   :  { %v22_v0 = vlaneseq  ;;  %vm46_vm0 = vcmask 1042432   ;;  %vm78_vm1 = vcmask 1045504   ;;  %vm55_vm2 = vcmask 1046528   ;;  %s490_s29 = smov 16   ;;  %s491_s30 = smov 8   ;;  %s695_s0 = inlined_call_operand.vmem [shape: f32[2,8,8], index: 0, kind: input, shape index: {}]   ;;  %s696_s1 = inlined_call_operand.vmem [shape: f32[40,16], index: 1, kind: input, shape index: {}]   ;;  %s697_s2 = inlined_call_operand.vmem [shape: f32[1,16], index: 2, kind: input, shape index: {}]   ;;  %s698_s3 = inlined_call_operand.vmem [shape: f32[48,8], index: 3, kind: input, shape index: {}]   ;;  %s699_s4 = inlined_call_operand.vmem [shape: f32[1,8], index: 4, kind: input, shape index: {}]   ;;  %s700_s5 = inlined_call_operand.vmem [shape: f32[2,8,8], index: 5, kind: output, shape index: {}]  }
   0x1   :  { %v527_v1 = vld [vmem:[%s695_s0] sm:$0xff]  ;;  %v540_v9 = vld [vmem:[%s695_s0 + $0x8] sm:$0xff]  ;;  %v170_v10 = vld [vmem:[%s696_s1 + $0x18] sm:$0xff]  ;;  %vm101_vm3 = vcmask 1044480   ;;  %vm124_vm4 = vcmask 1043456   ;;  %s493_s8 = smov 32  }
   0x2   :  { %v23_v2 = vshrl.u32 %v22_v0, 7  ;;  %v40_v5 = vrot.slane %v527_v1, 5  ;;  %v171_v6 = vld [vmem:[%s696_s1 + $0x20] sm:$0xff]  ;;  %v169_v11 = vld [vmem:[%s696_s1 + $0x10] sm:$0xff]  ;;  %v41_v22 = vrot.slane %v540_v9, 5  ;;  %v168_v25 = vld [vmem:[%s696_s1 + $0x8] sm:$0xff] }
   0x3   :  { %451 = vmatprep.subr.mxu0 %v171_v6  ;;  %v167_v29 = vld [vmem:[%s696_s1] sm:$0xff]  ;;  %s492_s1 = smov 24   ;;  %vm147_vm5 = vcmask 64512   ;;  %vm152_vm6 = vcmask 130048   ;;  %vm157_vm7 = vcmask 195584   ;;  %vm162_vm8 = vcmask 261120  }
   0x4   :  { %v24_v3 = vsub.s32 0, %v23_v2  ;;  %v32_v4 = vsub.s32 7, %v23_v2  ;;  %452 = vmatpush3.msra.mxu0 %v171_v6  ;;  %vm179_vm9 = vcmask 326656   ;;  %vm334_vm14 = vcmask 392192  }
   0x5   :  { %453 = vmatprep.subr.mxu0 %v170_v10 }
   0x6   :  { %v25_v7 = vrot.slane %v527_v1, %v24_v3  ;;  %v535_v8 = vrot.slane %v527_v1, %v32_v4  ;;  %454 = vmatpush3.msra.mxu0 %v170_v10  ;;  %v29_v20 = vrot.slane %v540_v9, %v24_v3  ;;  %v563_v21 = vrot.slane %v540_v9, %v32_v4 }
   0x7   :  { %455 = vmatprep.subr.mxu0 %v169_v11 }
   0x8   :  { %v549_v12 = vsel %vm46_vm0, %v25_v7, %v40_v5  ;;  %v553_v13 = vsel %vm46_vm0, %v40_v5, %v535_v8  ;;  %v82_v14 = vrot.slane %v535_v8, 2  ;;  %v59_v15 = vrot.slane %v535_v8, 1  ;;  %456 = vmatpush3.msra.mxu0 %v169_v11 }
   0x9   :  { %v79_v16 = vrot.slane %v549_v12, 2  ;;  %v80_v17 = vrot.slane %v553_v13, 2  ;;  %v56_v18 = vrot.slane %v549_v12, 1  ;;  %v57_v19 = vrot.slane %v553_v13, 1  ;;  %457 = vmatprep.subr.mxu0 %v168_v25 }
   0xa   :  { %v103_v26 = vrot.slane %v553_v13, 3  ;;  %v105_v27 = vrot.slane %v535_v8, 3  ;;  %v102_v28 = vrot.slane %v549_v12, 3  ;;  %v582_v32 = vsel %vm46_vm0, %v29_v20, %v41_v22  ;;  %458 = vmatpush3.msra.mxu0 %v168_v25 }
   0xb   :  { %v81_v23 = vsel %vm78_vm1, %v79_v16, %v80_v17  ;;  %v58_v24 = vsel %vm55_vm2, %v56_v18, %v57_v19  ;;  %v83_v30 = vsel %vm78_vm1, %v80_v17, %v82_v14  ;;  %v60_v31 = vsel %vm55_vm2, %v57_v19, %v59_v15  ;;  %459 = vmatprep.subr.mxu0 %v167_v29 }
   0xc   :  { %89 = vrot.lane.b32.xlu1 %v81_v23, %s490_s29  ;;  %66 = vrot.lane.b32.xlu0 %v58_v24, %s491_s30  ;;  %v586_v33 = vsel %vm46_vm0, %v41_v22, %v563_v21  ;;  %v106_v34 = vsel %vm101_vm3, %v103_v26, %v105_v27  ;;  %v104_v35 = vsel %vm101_vm3, %v102_v28, %v103_v26  ;;  %v61_v36 = vrot.slane %v582_v32, 1 }
   0xd   :  { %v62_v37 = vrot.slane %v586_v33, 1  ;;  %v125_v38 = vrot.slane %v549_v12, 4  ;;  %v126_v39 = vrot.slane %v553_v13, 4  ;;  %460 = vmatpush3.msra.mxu0 %v167_v29  ;;  %v64_v42 = vrot.slane %v563_v21, 1 }
   0xe   :  { %v128_v43 = vrot.slane %v535_v8, 4  ;;  %v85_v44 = vrot.slane %v586_v33, 2  ;;  %v87_v47 = vrot.slane %v563_v21, 2  ;;  %v84_v48 = vrot.slane %v582_v32, 2 }
   0xf   :  { %v63_v40 = vsel %vm55_vm2, %v61_v36, %v62_v37  ;;  %v127_v41 = vsel %vm124_vm4, %v125_v38, %v126_v39  ;;  %v65_v45 = vsel %vm55_vm2, %v62_v37, %v64_v42  ;;  %v108_v49 = vrot.slane %v586_v33, 3  ;;  %v326_v37 = vld [vmem:[%s698_s3 + $0x28] sm:$0xff]  ;;  %v325_v38 = vld [vmem:[%s698_s3 + $0x20] sm:$0xff] }
  0x10   :  { %91 = vrot.lane.b32.xlu1 %v83_v30, %s490_s29  ;;  %68 = vrot.lane.b32.xlu0 %v60_v31, %s491_s30  ;;  %v129_v46 = vsel %vm124_vm4, %v126_v39, %v128_v43  ;;  %v88_v50 = vsel %vm78_vm1, %v85_v44, %v87_v47  ;;  %v86_v51 = vsel %vm78_vm1, %v84_v48, %v85_v44  ;;  %v110_v52 = vrot.slane %v563_v21, 3  ;;  %v426_v31 = vld [vmem:[%s697_s2] ss:$0 sm:$0xff]  ;;  %v323_v43 = vld [vmem:[%s698_s3 + $0x10] sm:$0xff] }
  0x11   :  { %v107_v53 = vrot.slane %v582_v32, 3  ;;  %v131_v54 = vrot.slane %v586_v33, 4  ;;  %v133_v57 = vrot.slane %v563_v21, 4  ;;  %v130_v58 = vrot.slane %v582_v32, 4  ;;  %467 = vmatprep.subr.mxu1 %v326_v37  ;;  %v322_v48 = vld [vmem:[%s698_s3 + $0x8] sm:$0xff] }
  0x12   :  { %v111_v55 = vsel %vm101_vm3, %v108_v49, %v110_v52  ;;  %468 = vmatpush3.msra.mxu1 %v326_v37 }
  0x13   :  { %v109_v56 = vsel %vm101_vm3, %v107_v53, %v108_v49  ;;  %v134_v59 = vsel %vm124_vm4, %v131_v54, %v133_v57  ;;  %v132_v60 = vsel %vm124_vm4, %v130_v58, %v131_v54  ;;  %469 = vmatprep.subr.mxu1 %v325_v38  ;;  %v321_v49 = vld [vmem:[%s698_s3] sm:$0xff] }
  0x14   :  { %114 = vrot.lane.b32.xlu1 %v106_v34, %s492_s1  ;;  %112 = vrot.lane.b32.xlu0 %v104_v35, %s492_s1 }
  0x15   :  { %470 = vmatpush3.msra.mxu1 %v325_v38 }
  0x18   :  { %70 = vrot.lane.b32.xlu1 %v63_v40, %s491_s30  ;;  %135 = vrot.lane.b32.xlu0 %v127_v41, %s493_s8  ;;  %v324_v41 = vld [vmem:[%s698_s3 + $0x18] sm:$0xff] }
  0x19   :  { %471 = vmatprep.subr.mxu1 %v324_v41 }
  0x1a   :  { %472 = vmatpush3.msra.mxu1 %v324_v41 }
  0x1b   :  { %473 = vmatprep.subr.mxu1 %v323_v43 }
  0x1c   :  { %72 = vrot.lane.b32.xlu1 %v65_v45, %s491_s30  ;;  %137 = vrot.lane.b32.xlu0 %v129_v46, %s493_s8 }
  0x1d   :  { %474 = vmatpush3.msra.mxu1 %v323_v43 }
  0x1e   :  { %475 = vmatprep.subr.mxu1 %v322_v48 }
  0x1f   :  { %476 = vmatpush3.msra.mxu1 %v322_v48 }
  0x20   :  { %95 = vrot.lane.b32.xlu1 %v88_v50, %s490_s29  ;;  %93 = vrot.lane.b32.xlu0 %v86_v51, %s490_s29 }
  0x21   :  { %477 = vmatprep.subr.mxu1 %v321_v49 }
  0x22   :  { %478 = vmatpush3.msra.mxu1 %v321_v49 }
  0x24   :  { %118 = vrot.lane.b32.xlu1 %v111_v55, %s492_s1  ;;  %116 = vrot.lane.b32.xlu0 %v109_v56, %s492_s1 }
  0x28   :  { %141 = vrot.lane.b32.xlu1 %v134_v59, %s493_s8  ;;  %139 = vrot.lane.b32.xlu0 %v132_v60, %s493_s8 }
  0x7e   :  { %v90_v61 = vpop.permute.xlu1 %89  ;;  %v67_v62 = vpop.permute.xlu0 %66 }
  0x7f   :  { %v148_v2 = vsel %vm147_vm5, %v549_v12, %v67_v62 }
  0x80   :  { %v153_v5 = vsel %vm152_vm6, %v148_v2, %v90_v61 }
  0x82   :  { %v92_v63 = vpop.permute.xlu1 %91  ;;  %v69_v0 = vpop.permute.xlu0 %68 }
  0x83   :  { %v149_v6 = vsel %vm147_vm5, %v553_v13, %v69_v0 }
  0x84   :  { %v154_v12 = vsel %vm152_vm6, %v149_v6, %v92_v63 }
  0x86   :  { %v115_v3 = vpop.permute.xlu1 %114  ;;  %v113_v4 = vpop.permute.xlu0 %112 }
  0x87   :  { %v158_v7 = vsel %vm157_vm7, %v153_v5, %v113_v4  ;;  %v159_v14 = vsel %vm157_vm7, %v154_v12, %v115_v3  ;;  %v431_v12 = vld [vmem:[%s699_s4] ss:$0 sm:$0xff] }
  0x8a   :  { %v71_v8 = vpop.permute.xlu1 %70  ;;  %v136_v10 = vpop.permute.xlu0 %135 }
  0x8b   :  { %v163_v11 = vsel %vm162_vm8, %v158_v7, %v136_v10  ;;  %v150_v21 = vsel %vm147_vm5, %v582_v32, %v71_v8 }
  0x8c   :  { %461 = vmatprep.mubr.msk.f32.mxu0 %vm179_vm9, %v163_v11 }
  0x8e   :  { %v73_v15 = vpop.permute.xlu1 %72  ;;  %v138_v16 = vpop.permute.xlu0 %137 }
  0x8f   :  { %v164_v17 = vsel %vm162_vm8, %v159_v14, %v138_v16  ;;  %v151_v22 = vsel %vm147_vm5, %v586_v33, %v73_v15 }
  0x90   :  { %462 = vmatmul.mubr.msk.f32.vlgmr.msra.gmra.mxu0 %vm179_vm9, %v164_v17 }
  0x92   :  { %v96_v18 = vpop.permute.xlu1 %95  ;;  %v94_v13 = vpop.permute.xlu0 %93 }
  0x93   :  { %v156_v23 = vsel %vm152_vm6, %v151_v22, %v96_v18  ;;  %v155_v24 = vsel %vm152_vm6, %v150_v21, %v94_v13 }
  0x96   :  { %v119_v19 = vpop.permute.xlu1 %118  ;;  %v117_v20 = vpop.permute.xlu0 %116 }
  0x97   :  { %v161_v25 = vsel %vm157_vm7, %v156_v23, %v119_v19  ;;  %v160_v26 = vsel %vm157_vm7, %v155_v24, %v117_v20 }
  0x9a   :  { %v142_v27 = vpop.permute.xlu1 %141  ;;  %v140_v28 = vpop.permute.xlu0 %139 }
  0x9b   :  { %v166_v29 = vsel %vm162_vm8, %v161_v25, %v142_v27  ;;  %v165_v30 = vsel %vm162_vm8, %v160_v26, %v140_v28 }
  0x9c   :  { %464 = vmatprep.mubr.msk.f32.mxu0 %vm179_vm9, %v165_v30 }
  0x9d   :  { %465 = vmatmul.mubr.msk.f32.gmra.mxu0 %vm179_vm9, %v166_v29 }
 0x150   :  { %v463_v32 = vpop.f32.mrf.mxu0 }
 0x151   :  { %v264_v33 = vadd.f32 %v463_v32, %v426_v31 }
 0x152   :  { %v258_v34 = vpop.f32.mrf.mxu0 }
 0x153   :  { %vm278_vm10 = vcmp.gt.f32.partialorder %v264_v33, 0.0  ;;  %v282_v35 = vmul.f32 0.01, %v264_v33  ;;  %v259_v36 = vadd.f32 %v426_v31, %v258_v34 }
 0x155   :  { %v286_v39 = vsel %vm278_vm10, %v264_v33, %v282_v35  ;;  %vm277_vm11 = vcmp.gt.f32.partialorder %v259_v36, 0.0  ;;  %v281_v40 = vmul.f32 0.01, %v259_v36 }
 0x156   :  { %v294_v44 = vrot.slane %v286_v39, 1  ;;  %v306_v50 = vrot.slane %v286_v39, 2 }
 0x157   :  { %v285_v42 = vsel %vm277_vm11, %v259_v36, %v281_v40 }
 0x158   :  { %v293_v45 = vrot.slane %v285_v42, 1  ;;  %v305_v47 = vrot.slane %v285_v42, 2 }
 0x15a   :  { %v295_v46 = vsel %vm55_vm2, %v293_v45, %v294_v44  ;;  %v307_v53 = vsel %vm78_vm1, %v305_v47, %v306_v50 }
 0x15b   :  { %299 = vrot.lane.b32.xlu0 %v295_v46, %s490_s29 }
 0x15d   :  { %v466_v51 = vpop.f32.mrf.mxu0 }
 0x15e   :  { %v274_v52 = vadd.f32 %v466_v51, %v426_v31 }
 0x15f   :  { %311 = vrot.lane.b32.xlu0 %v307_v53, %s493_s8  ;;  %v268_v54 = vpop.f32.mrf.mxu0 }
 0x160   :  { %vm280_vm12 = vcmp.gt.f32.partialorder %v274_v52, 0.0  ;;  %v284_v55 = vmul.f32 0.01, %v274_v52  ;;  %v269_v56 = vadd.f32 %v426_v31, %v268_v54 }
 0x162   :  { %v288_v57 = vsel %vm280_vm12, %v274_v52, %v284_v55  ;;  %vm279_vm13 = vcmp.gt.f32.partialorder %v269_v56, 0.0  ;;  %v283_v58 = vmul.f32 0.01, %v269_v56 }
 0x163   :  { %v297_v60 = vrot.slane %v288_v57, 1  ;;  %v309_v0 = vrot.slane %v288_v57, 2 }
 0x164   :  { %v287_v59 = vsel %vm279_vm13, %v269_v56, %v283_v58 }
 0x165   :  { %v296_v61 = vrot.slane %v287_v59, 1  ;;  %v308_v63 = vrot.slane %v287_v59, 2 }
 0x167   :  { %v298_v62 = vsel %vm55_vm2, %v296_v61, %v297_v60  ;;  %v310_v2 = vsel %vm78_vm1, %v308_v63, %v309_v0 }
 0x168   :  { %301 = vrot.lane.b32.xlu1 %v298_v62, %s490_s29 }
 0x16c   :  { %313 = vrot.lane.b32.xlu1 %v310_v2, %s493_s8 }
 0x1cd   :  { %v300_v3 = vpop.permute.xlu0 %299 }
 0x1ce   :  { %v317_v4 = vsel %vm152_vm6, %v285_v42, %v300_v3 }
 0x1d1   :  { %v312_v5 = vpop.permute.xlu0 %311 }
 0x1d2   :  { %v319_v6 = vsel %vm162_vm8, %v317_v4, %v312_v5 }
 0x1d3   :  { %479 = vmatprep.mubr.msk.f32.mxu1 %vm334_vm14, %v319_v6 }
 0x1da   :  { %v302_v7 = vpop.permute.xlu1 %301 }
 0x1db   :  { %v318_v8 = vsel %vm152_vm6, %v287_v59, %v302_v7 }
 0x1de   :  { %v314_v10 = vpop.permute.xlu1 %313 }
 0x1df   :  { %v320_v11 = vsel %vm162_vm8, %v318_v8, %v314_v10 }
 0x1e0   :  { %480 = vmatmul.mubr.msk.f32.vlgmr.msra.gmra.mxu1 %vm334_vm14, %v320_v11 }
 0x2a0   :  { %v481_v14 = vpop.f32.mrf.mxu1 }
 0x2a1   :  { %v413_v15 = vadd.f32 %v481_v14, %v431_v12 }
 0x2a2   :  { %v407_v16 = vpop.f32.mrf.mxu1 }
 0x2a3   :  { %486 = vtanh.f32 %v413_v15  ;;  %v408_v17 = vadd.f32 %v431_v12, %v407_v16 }
 0x2a5   :  { %488 = vtanh.f32 %v408_v17 }
 0x2b0   :  { %v487_v18 = vpop.eup %486 }
 0x2b1   :  { %v419_v13 = vadd.f32 %v487_v18, %v540_v9 }
 0x2b2   :  { %v489_v19 = vpop.eup %488 }
 0x2b3   :  { %421 = vst.msk [vmem:[%s700_s5 + $0x8] sm:$0xff] %vm147_vm5, %v419_v13  ;;  %v418_v20 = vadd.f32 %v489_v19, %v527_v1 }
 0x2b5   :  { %420 = vst.msk [vmem:[%s700_s5] sm:$0xff] %vm147_vm5, %v418_v20 }

</bundles_post_ra>
